<compile_context>
chip_gen: v7x
topology: tpu7x:2x2x1
jax: 0.10.0
libtpu: 0.0.40
codegen_flags: <defaults>
</compile_context>

<pallas_src>
import jax
import jax.numpy as jnp
from jax import lax
from jax.experimental import pallas as pl
from jax.experimental.pallas import tpu as pltpu


_LANE = 128  # test-point tile alignment (lane dim of the (2, tile_n) output block)


def _round_up(x, m):
    return ((x + m - 1) // m) * m


def _posterior_predictive_kernel(beta_ref, phi_ref, mrow_ref, sN_ref, out_ref):
    """One (tile_n, D) tile of test points -> (2, tile_n) [mean; variance] block."""
    inv_beta = beta_ref[0]                                  # SMEM scalar: 1 / beta
    phi = phi_ref[...]                                      # (tile_n, D) f32
    # Quadratic-form matmul on the MXU with f32 accumulation: Phi @ S_N.
    t = jnp.dot(phi, sN_ref[...], preferred_element_type=jnp.float32)    # (tile_n, D)
    # Mean / variance rows produced directly lane-major as (1, tile_n): contract the
    # D axis of both operands (trans_b-style dot_general).  This avoids any
    # sublane->lane relayout before the compact (2, tile_n) store; the M=1 matmuls
    # are essentially free on the massively underfilled MXU at these shapes.
    dnums = (((1,), (1,)), ((), ()))
    y_row = lax.dot_general(mrow_ref[...], phi, dnums,
                            preferred_element_type=jnp.float32)          # (1, tile_n)
    ones_row = jnp.ones((1, phi.shape[1]), dtype=jnp.float32)
    quad_row = lax.dot_general(ones_row, t * phi, dnums,
                               preferred_element_type=jnp.float32)       # (1, tile_n)
    out_ref[0:1, :] = y_row
    out_ref[1:2, :] = inv_beta + quad_row


def posterior_predictive(x, m_N, S_N, beta, *, tile_n=8192):
    """Bayesian-linear posterior predictive. Returns (y, y_var), both shape (N,)."""
    N, D = x.shape
    x = x.astype(jnp.float32)
    m_row = m_N.astype(jnp.float32).reshape(1, D)
    S_N = S_N.astype(jnp.float32)
    inv_beta = (1.0 / jnp.asarray(beta, jnp.float32)).reshape(1)

    # Tile the test-point axis.  Multiple of 128 so the lane-major (2, tile_n) output
    # block satisfies the (8, 128) constraint; shrink the tile for small N instead of
    # padding to the full default.
    tile_n = min(int(tile_n), _round_up(N, _LANE))
    tile_n = _round_up(tile_n, _LANE)
    n_pad = _round_up(N, tile_n)
    if n_pad != N:
        x = jnp.pad(x, ((0, n_pad - N), (0, 0)))
    grid = (n_pad // tile_n,)

    # Generation-aware VMEM budget: double-buffered Phi tiles + output blocks,
    # (possibly double-buffered) resident S_N / m_N, plus internal-scratch headroom.
    est_bytes = (2 * tile_n * D + 2 * 2 * tile_n + 2 * D * D + 2 * D) * 4
    try:
        vmem_cap = int(pltpu.get_tpu_info().vmem_capacity_bytes)
    except Exception:
        vmem_cap = 64 << 20  # conservative (v7x physical) fallback
    vmem_limit = int(min(max(est_bytes + (8 << 20), 32 << 20), int(vmem_cap * 0.8)))
    # TODO(synk): for very large D (f32 S_N >= ~16 MiB) this resident-S_N layout should
    # switch to a bf16 S_N or a D-reduction grid axis, especially on v7x (64 MiB VMEM).

    cost = pl.CostEstimate(
        flops=int(2 * n_pad * D * (D + 2) + n_pad * D),
        transcendentals=0,
        bytes_accessed=int(4 * (n_pad * D + D * D + D + 2 * n_pad + 1)),
    )

    out = pl.pallas_call(
        _posterior_predictive_kernel,
        out_shape=jax.ShapeDtypeStruct((2, n_pad), jnp.float32),
        grid=grid,
        in_specs=[
            pl.BlockSpec(memory_space=pltpu.MemorySpace.SMEM),  # 1/beta scalar
            pl.BlockSpec((tile_n, D), lambda i: (i, 0)),        # Phi tile (pipelined)
            pl.BlockSpec((1, D), lambda i: (0, 0)),             # m_N row (VMEM-resident)
            pl.BlockSpec((D, D), lambda i: (0, 0)),             # S_N (VMEM-resident)
        ],
        out_specs=pl.BlockSpec((2, tile_n), lambda i: (0, i)),  # compact, lane-dense
        compiler_params=pltpu.CompilerParams(
            # TODO(synk): on v7x, verify "parallel" shards the N axis across both
            # TensorCores; otherwise switch this axis to pltpu.CORE_PARALLEL.
            dimension_semantics=("parallel",),
            vmem_limit_bytes=vmem_limit,
        ),
        cost_estimate=cost,
    )(inv_beta, x, m_row, S_N)

    y = out[0, :N]       # contiguous row slices (layout plumbing only)
    y_var = out[1, :N]
    return y, y_var


class BayesianLinearModelPallas:
    """JAX/Pallas port of BayesianLinearModelBotorch (identity basis_fn)."""

    num_outputs = 1

    def __init__(self, dims, alpha, beta, train_X, train_Y, basis_fn):
        self.dims = dims
        self.alpha = alpha
        self.beta = beta
        self.train_X = train_X
        self.train_Y = train_Y
        self.basis_fn = basis_fn
        self._fit()

    def _fit(self):
        # TODO(synk): matrix inverse has no clean Pallas equivalent; one-off plain-JAX setup.
        Phi = self.basis_fn(self.train_X).astype(jnp.float32)               # (M, D)
        eye = jnp.eye(Phi.shape[1], dtype=jnp.float32)
        self.S_N_inv = self.alpha * eye + self.beta * (Phi.T @ Phi)
        self.S_N = jnp.linalg.inv(self.S_N_inv)                             # (D, D)
        self.m_N = self.beta * (self.S_N @ (Phi.T @ self.train_Y.astype(jnp.float32)))  # (D, 1)

    def forward(self, x):
        Phi = self.basis_fn(x)
        y, y_var = posterior_predictive(Phi, self.m_N, self.S_N, self.beta)
        # TODO(synk): torch wraps (y, diag(y_var)) in a MultivariateNormal; we return the
        # parameters.  For large N prefer returning y_var directly rather than the dense
        # N x N diagonal (O(N^2) HBM).
        covar = jnp.diag(y_var)
        return y, covar

    __call__ = forward


if __name__ == "__main__":
    key = jax.random.PRNGKey(0)
    k1, k2, k3 = jax.random.split(key, 3)

    D = 32          # feature dim (dims)
    M_TRAIN = 16    # training points
    N_TEST = 8      # test points

    train_X = jax.random.normal(k1, (M_TRAIN, D), dtype=jnp.float32)
    train_Y = jax.random.normal(k2, (M_TRAIN, 1), dtype=jnp.float32)
    train_Y = (train_Y - train_Y.mean()) / (train_Y.std() + 1e-6)

    model = BayesianLinearModelPallas(
        dims=D, alpha=1.0, beta=2.0,
        train_X=train_X, train_Y=train_Y,
        basis_fn=lambda z: z,   # identity basis
    )

    x = jax.random.normal(k3, (N_TEST, D), dtype=jnp.float32)
    y, covar = model(x)
    jax.block_until_ready((y, covar))

    # Reference check in plain JAX.
    Phi = x
    y_ref = (Phi @ model.m_N)[:, 0]
    y_var_ref = 1.0 / model.beta + jnp.sum((Phi @ model.S_N) * Phi, axis=-1)
    assert jnp.allclose(y, y_ref, atol=1e-3, rtol=1e-3)
    assert jnp.allclose(jnp.diag(covar), y_var_ref, atol=1e-3, rtol=1e-3)
    assert y.shape == (N_TEST,) and covar.shape == (N_TEST, N_TEST)

    print("KERNEL_OK")
</pallas_src>

<mosaic_0001>
module attributes {stable_mosaic.version = 11 : i64} {
  func.func @_posterior_predictive_kernel(%arg0: i32, %arg1: memref<1xf32, #tpu.memory_space<smem>>, %arg2: memref<128x32xf32, #tpu.memory_space<vmem>>, %arg3: memref<1x32xf32, #tpu.memory_space<vmem>>, %arg4: memref<32x32xf32, #tpu.memory_space<vmem>>, %arg5: memref<2x128xf32, #tpu.memory_space<vmem>>) attributes {dimension_semantics = [#tpu.dimension_semantics<parallel>], iteration_bounds = array<i64: 1>, scalar_prefetch = 0 : i64, scratch_operands = 0 : i64, tpu.core_type = #tpu.core_type<tc>, window_params = [{transform_indices = @transform_0, window_bounds = array<i64: 1>}, {transform_indices = @transform_1, window_bounds = array<i64: 128, 32>}, {pipeline_mode = #tpu.pipeline_mode<synchronous>, transform_indices = @transform_2, window_bounds = array<i64: 1, 32>}, {pipeline_mode = #tpu.pipeline_mode<synchronous>, transform_indices = @transform_3, window_bounds = array<i64: 32, 32>}, {transform_indices = @transform_4, window_bounds = array<i64: 2, 128>}]} {
    %c0 = arith.constant 0 : index
    %0 = memref.load %arg1[%c0] : memref<1xf32, #tpu.memory_space<smem>>
    %c0_0 = arith.constant 0 : index
    %c0_1 = arith.constant 0 : index
    %1 = vector.load %arg2[%c0_0, %c0_1] : memref<128x32xf32, #tpu.memory_space<vmem>>, vector<128x32xf32>
    %c0_2 = arith.constant 0 : index
    %c0_3 = arith.constant 0 : index
    %2 = vector.load %arg4[%c0_2, %c0_3] : memref<32x32xf32, #tpu.memory_space<vmem>>, vector<32x32xf32>
    %cst = arith.constant dense<0.000000e+00> : vector<128x32xf32>
    %3 = tpu.matmul %1, %2, %cst {dimension_numbers = #tpu.dot_dimension_numbers<[1], [0], [0], [1], [0, 0, 1, 1], [], []>} : vector<128x32xf32>, vector<32x32xf32>, vector<128x32xf32> -> vector<128x32xf32>
    %c0_4 = arith.constant 0 : index
    %c0_5 = arith.constant 0 : index
    %4 = vector.load %arg3[%c0_4, %c0_5] : memref<1x32xf32, #tpu.memory_space<vmem>>, vector<1x32xf32>
    %cst_6 = arith.constant dense<0.000000e+00> : vector<1x128xf32>
    %5 = tpu.matmul %4, %1, %cst_6 {dimension_numbers = #tpu.dot_dimension_numbers<[1], [1], [0], [0], [0, 0, 1, 0], [], []>} : vector<1x32xf32>, vector<128x32xf32>, vector<1x128xf32> -> vector<1x128xf32>
    %cst_7 = arith.constant 1.000000e+00 : f32
    %6 = vector.broadcast %cst_7 : f32 to vector<1x32xf32>
    %7 = arith.mulf %3, %1 : vector<128x32xf32>
    %cst_8 = arith.constant dense<0.000000e+00> : vector<1x128xf32>
    %8 = tpu.matmul %6, %7, %cst_8 {dimension_numbers = #tpu.dot_dimension_numbers<[1], [1], [0], [0], [0, 0, 1, 0], [], []>} : vector<1x32xf32>, vector<128x32xf32>, vector<1x128xf32> -> vector<1x128xf32>
    %c0_9 = arith.constant 0 : index
    %c0_10 = arith.constant 0 : index
    %9 = vector.load %arg5[%c0_9, %c0_10] : memref<2x128xf32, #tpu.memory_space<vmem>>, vector<1x128xf32>
    tpu.vector_store %arg5[%c0_9, %c0_10], %5 {strides = array<i32>} : memref<2x128xf32, #tpu.memory_space<vmem>>, vector<1x128xf32>,
    %10 = vector.broadcast %0 : f32 to vector<1x128xf32>
    %11 = arith.addf %10, %8 : vector<1x128xf32>
    %c1 = arith.constant 1 : index
    %c0_11 = arith.constant 0 : index
    %12 = vector.load %arg5[%c1, %c0_11] : memref<2x128xf32, #tpu.memory_space<vmem>>, vector<1x128xf32>
    tpu.vector_store %arg5[%c1, %c0_11], %11 {strides = array<i32>} : memref<2x128xf32, #tpu.memory_space<vmem>>, vector<1x128xf32>,
    return
  }
  func.func @transform_0(%arg0: i32) -> i32 {
    %c0_i32 = arith.constant 0 : i32
    %c0_i32_0 = arith.constant 0 : i32
    return %c0_i32 : i32
  }
  func.func @transform_1(%arg0: i32) -> (i32, i32) {
    %c0_i32 = arith.constant 0 : i32
    %c0_i32_0 = arith.constant 0 : i32
    return %arg0, %c0_i32 : i32, i32
  }
  func.func @transform_2(%arg0: i32) -> (i32, i32) {
    %c0_i32 = arith.constant 0 : i32
    %c0_i32_0 = arith.constant 0 : i32
    %c0_i32_1 = arith.constant 0 : i32
    return %c0_i32, %c0_i32_0 : i32, i32
  }
  func.func @transform_3(%arg0: i32) -> (i32, i32) {
    %c0_i32 = arith.constant 0 : i32
    %c0_i32_0 = arith.constant 0 : i32
    %c0_i32_1 = arith.constant 0 : i32
    return %c0_i32, %c0_i32_0 : i32, i32
  }
  func.func @transform_4(%arg0: i32) -> (i32, i32) {
    %c0_i32 = arith.constant 0 : i32
    %c0_i32_0 = arith.constant 0 : i32
    return %c0_i32, %arg0 : i32, i32
  }
}

</mosaic_0001>

<bundles_post_ra>
// kernel: tpu_custom_call.1
= control target key start
LH: loop header
LB: loop body
LE: loop exit
PB: predicated region body
PF: predicated region fallthrough
CT: control target
= control target key end

     0   :  { %vm40_vm0 = vcmask 261120   ;;  %s1030_s0 = inlined_call_operand.<no memory space> [shape: f32[1], index: 0, kind: input, shape index: {}]   ;;  %s1031_s1 = inlined_call_operand.vmem [shape: f32[128,32], index: 1, kind: input, shape index: {}]   ;;  %s1032_s2 = inlined_call_operand.vmem [shape: f32[1,32], index: 2, kind: input, shape index: {}]   ;;  %s1033_s3 = inlined_call_operand.vmem [shape: f32[32,32], index: 3, kind: input, shape index: {}]   ;;  %s1034_s4 = inlined_call_operand.hbm [shape: f32[2,128], index: 4, kind: output, shape index: {}]  }
   0x1   :  { %v36_v0 = vld [vmem:[%s1033_s3] sm:$0xff]  ;;  %v37_v1 = vld [vmem:[%s1033_s3 + $0x8] sm:$0xff]  ;;  %v38_v2 = vld [vmem:[%s1033_s3 + $0x10] sm:$0xff] }
   0x2   :  { %v669_v3 = vpack.c.bf16 %v37_v1, %v36_v0  ;;  %v39_v4 = vld [vmem:[%s1033_s3 + $0x18] sm:$0xff]  ;;  %v815_v5 = vld [vmem:[%s1031_s1] sm:$0xff] }
   0x3   :  { %v673_v6 = vpack.c.bf16 %v39_v4, %v38_v2  ;;  %575 = vmatprep.mubr.msk.f32.mxu0 %vm40_vm0, %v815_v5 }
   0x4   :  { %670 = vmatprep.subr.bf16.mxu0 %v669_v3 }
   0x5   :  { %672 = vmatpush3.bf16.msra.mxu0 %v669_v3 }
   0x6   :  { %674 = vmatprep.subr.bf16.mxu0 %v673_v6 }
   0x7   :  { %10 = vsyncpa [#allocation4], 0  ;;  %v822_v7 = vld [vmem:[%s1031_s1 + $0x8] sm:$0xff]  ;;  %v827_v8 = vld [vmem:[%s1031_s1 + $0x10] sm:$0xff]  ;;  %v770_v23 = vmov 0.0|0.0   ;;  %vm771_vm2 = vmmov 0  }
   0x8   :  { %v836_v9 = vld [vmem:[%s1031_s1 + $0x18] sm:$0xff]  ;;  %v841_v10 = vld [vmem:[%s1031_s1 + $0x20] sm:$0xff]  ;;  %v850_v11 = vld [vmem:[%s1031_s1 + $0x28] sm:$0xff]  ;;  %677 = vmatprep.subr.bf16.mxu1 %v770_v23  ;;  %v678_v24 = vpack.c.bf16 %v822_v7, %v815_v5  ;;  %v772_v32 = vmov 0.0   ;;  %s774_s29 = smov [#allocation3]  }
   0x9   :  { %676 = vmatpush3.bf16.msra.mxu0 %v673_v6  ;;  %v855_v12 = vld [vmem:[%s1031_s1 + $0x30] sm:$0xff]  ;;  %v864_v13 = vld [vmem:[%s1031_s1 + $0x38] sm:$0xff]  ;;  %v869_v14 = vld [vmem:[%s1031_s1 + $0x40] sm:$0xff]  ;;  %v682_v25 = vpack.c.bf16 %v836_v9, %v827_v8  ;;  %v686_v26 = vpack.c.bf16 %v850_v11, %v841_v10  ;;  %631 = vmatprep.mubr.msk.f32.mxu1 %vm771_vm2, %v772_v32  ;;  %s455_s30 = sshll.u32 %s774_s29, 4  ;;  %s456_s30 = int_to_ptr.vmem [resolvable:$true] %s455_s30 }
   0xa   :  { %v878_v15 = vld [vmem:[%s1031_s1 + $0x48] sm:$0xff]  ;;  %v883_v16 = vld [vmem:[%s1031_s1 + $0x50] sm:$0xff]  ;;  %v892_v17 = vld [vmem:[%s1031_s1 + $0x58] sm:$0xff]  ;;  %709 = vmatprep.subr.bf16.mxu0 %v770_v23  ;;  %v690_v27 = vpack.c.bf16 %v864_v13, %v855_v12  ;;  %s746_s5 = scalar_lea.vmem %s456_s30, 32  ;;  %p751_p1 = scmp.lt.s32.totalorder %s456_s30, %s456_s30 }
   0xb   :  { %v897_v18 = vld [vmem:[%s1031_s1 + $0x60] sm:$0xff]  ;;  %v906_v19 = vld [vmem:[%s1031_s1 + $0x68] sm:$0xff]  ;;  %v911_v20 = vld [vmem:[%s1031_s1 + $0x70] sm:$0xff]  ;;  %v694_v28 = vpack.c.bf16 %v878_v15, %v869_v14  ;;  %v698_v29 = vpack.c.bf16 %v892_v17, %v883_v16  ;;  %p747_p0 = scmp.ne.s32.totalorder %s456_s30, %s746_s5  ;;  %p752_p2 = scmp.lt.s32.totalorder %s746_s5, %s746_s5 }
   0xc   :  { %576 = vmatmul.mubr.msk.f32.vlgmr.msra.gmra.mrb[0].mxu0 %vm40_vm0, %v822_v7  ;;  %v920_v21 = vld [vmem:[%s1031_s1 + $0x78] sm:$0xff]  ;;  %vm926_vm1 = vmpackc.low %vm40_vm0, %vm40_vm0  ;;  %v702_v30 = vpack.c.bf16 %v906_v19, %v897_v18  ;;  %v234_v33 = vld [vmem:[%s1032_s2] sm:$0x1] }
   0xd   :  { %578 = vmatprep.mubr.msk.f32.mxu0 %vm40_vm0, %v827_v8  ;;  %680 = vmatpush3.bf16.xpose.msk.msra.mxu1 %vm926_vm1, %v678_v24  ;;  %v706_v31 = vpack.c.bf16 %v920_v21, %v911_v20  ;;  %p753_p3 = por %p752_p2, %p751_p1 }
   0xe   :  { %681 = vmatprep.subr.bf16.mxu1 %v770_v23 }
   0xf   :  { %p754_p4 = pnand %p753_p3, %p747_p0 }
  0x10   :  { %579 = vmatmul.mubr.msk.f32.gmra.mrb[2].mxu0 %vm40_vm0, %v836_v9 }
  0x11   :  { %581 = vmatprep.mubr.msk.f32.mxu0 %vm40_vm0, %v841_v10 }
  0x14   :  { %582 = vmatmul.mubr.msk.f32.gmra.mrb[4].mxu0 %vm40_vm0, %v850_v11 }
  0x15   :  { %584 = vmatprep.mubr.msk.f32.mxu0 %vm40_vm0, %v855_v12  ;;  %684 = vmatpush3.bf16.xpose.msk.msra.mxu1 %vm926_vm1, %v682_v25 }
  0x16   :  { %685 = vmatprep.subr.bf16.mxu1 %v770_v23 }
  0x18   :  { %585 = vmatmul.mubr.msk.f32.gmra.mrb[6].mxu0 %vm40_vm0, %v864_v13 }
  0x19   :  { %587 = vmatprep.mubr.msk.f32.mxu0 %vm40_vm0, %v869_v14 }
  0x1c   :  { %588 = vmatmul.mubr.msk.f32.gmra.mrb[8].mxu0 %vm40_vm0, %v878_v15 }
  0x1d   :  { %590 = vmatprep.mubr.msk.f32.mxu0 %vm40_vm0, %v883_v16  ;;  %688 = vmatpush3.bf16.xpose.msk.msra.mxu1 %vm926_vm1, %v686_v26 }
  0x1e   :  { %689 = vmatprep.subr.bf16.mxu1 %v770_v23 }
  0x20   :  { %591 = vmatmul.mubr.msk.f32.gmra.mrb[10].mxu0 %vm40_vm0, %v892_v17 }
  0x21   :  { %593 = vmatprep.mubr.msk.f32.mxu0 %vm40_vm0, %v897_v18 }
  0x24   :  { %594 = vmatmul.mubr.msk.f32.gmra.mrb[12].mxu0 %vm40_vm0, %v906_v19 }
  0x25   :  { %596 = vmatprep.mubr.msk.f32.mxu0 %vm40_vm0, %v911_v20  ;;  %692 = vmatpush3.bf16.xpose.msk.msra.mxu1 %vm926_vm1, %v690_v27 }
  0x26   :  { %693 = vmatprep.subr.bf16.mxu1 %v770_v23 }
  0x28   :  { %597 = vmatmul.mubr.msk.f32.gmra.mrb[14].mxu0 %vm40_vm0, %v920_v21 }
  0x29   :  { %666 = vmatprep.mubr.msk.f32.mxu0 %vm771_vm2, %v772_v32 }
  0x2d   :  { %696 = vmatpush3.bf16.xpose.msk.msra.mxu1 %vm926_vm1, %v694_v28 }
  0x2e   :  { %697 = vmatprep.subr.bf16.mxu1 %v770_v23 }
  0x35   :  { %700 = vmatpush3.bf16.xpose.msk.msra.mxu1 %vm926_vm1, %v698_v29 }
  0x36   :  { %701 = vmatprep.subr.bf16.mxu1 %v770_v23 }
  0x3d   :  { %704 = vmatpush3.bf16.xpose.msk.msra.mxu1 %vm926_vm1, %v702_v30 }
  0x3e   :  { %705 = vmatprep.subr.bf16.mxu1 %v770_v23 }
  0x45   :  { %708 = vmatpush3.bf16.xpose.msk.msra.mxu1 %vm926_vm1, %v706_v31 }
  0x4c   :  { %632 = vmatmul.mubr.msk.f32.vlgmr.msra.gmra.mrb[0].mxu1 %vm40_vm0, %v234_v33 }
  0xdf   :  { %v577_v34 = vpop.f32.mrb[0].mxu0 }
  0xe0   :  { %v309_v35 = vmul.f32 %v577_v34, %v822_v7  ;;  %v155_v36 = vpop.f32.mrb[1].mxu0 }
  0xe1   :  { %v308_v37 = vmul.f32 %v155_v36, %v815_v5 }
  0xe3   :  { %v710_v38 = vpack.c.bf16 %v309_v35, %v308_v37  ;;  %v580_v39 = vpop.f32.mrb[2].mxu0 }
  0xe4   :  { %v311_v40 = vmul.f32 %v580_v39, %v836_v9  ;;  %v165_v41 = vpop.f32.mrb[3].mxu0 }
  0xe5   :  { %712 = vmatpush3.bf16.xpose.msk.msra.mxu0 %vm926_vm1, %v710_v38  ;;  %v310_v42 = vmul.f32 %v165_v41, %v827_v8 }
  0xe6   :  { %713 = vmatprep.subr.bf16.mxu0 %v770_v23 }
  0xe7   :  { %v714_v43 = vpack.c.bf16 %v311_v40, %v310_v42  ;;  %v583_v44 = vpop.f32.mrb[4].mxu0 }
  0xe8   :  { %v313_v45 = vmul.f32 %v583_v44, %v850_v11  ;;  %v175_v46 = vpop.f32.mrb[5].mxu0 }
  0xe9   :  { %v312_v47 = vmul.f32 %v175_v46, %v841_v10  ;;  %v773_v10 = vmov 1.0  }
  0xeb   :  { %v718_v48 = vpack.c.bf16 %v313_v45, %v312_v47  ;;  %v586_v49 = vpop.f32.mrb[6].mxu0 }
  0xec   :  { %v315_v50 = vmul.f32 %v586_v49, %v864_v13  ;;  %v185_v51 = vpop.f32.mrb[7].mxu0  ;;  %v446_v13 = vstv %s1030_s0 }
  0xed   :  { %716 = vmatpush3.bf16.xpose.msk.msra.mxu0 %vm926_vm1, %v714_v43  ;;  %v314_v52 = vmul.f32 %v185_v51, %v855_v12 }
  0xee   :  { %717 = vmatprep.subr.bf16.mxu0 %v770_v23 }
  0xef   :  { %v722_v53 = vpack.c.bf16 %v315_v50, %v314_v52  ;;  %v589_v54 = vpop.f32.mrb[8].mxu0 }
  0xf0   :  { %v317_v55 = vmul.f32 %v589_v54, %v878_v15  ;;  %v195_v56 = vpop.f32.mrb[9].mxu0 }
  0xf1   :  { %v316_v57 = vmul.f32 %v195_v56, %v869_v14 }
  0xf3   :  { %v726_v58 = vpack.c.bf16 %v317_v55, %v316_v57  ;;  %v592_v59 = vpop.f32.mrb[10].mxu0 }
  0xf4   :  { %v319_v60 = vmul.f32 %v592_v59, %v892_v17  ;;  %v205_v61 = vpop.f32.mrb[11].mxu0 }
  0xf5   :  { %720 = vmatpush3.bf16.xpose.msk.msra.mxu0 %vm926_vm1, %v718_v48  ;;  %v318_v62 = vmul.f32 %v205_v61, %v883_v16 }
  0xf6   :  { %721 = vmatprep.subr.bf16.mxu0 %v770_v23 }
  0xf7   :  { %v730_v63 = vpack.c.bf16 %v319_v60, %v318_v62  ;;  %v595_v0 = vpop.f32.mrb[12].mxu0 }
  0xf8   :  { %v321_v1 = vmul.f32 %v595_v0, %v906_v19  ;;  %v215_v2 = vpop.f32.mrb[13].mxu0 }
  0xf9   :  { %v320_v3 = vmul.f32 %v215_v2, %v897_v18 }
  0xfb   :  { %v734_v4 = vpack.c.bf16 %v321_v1, %v320_v3  ;;  %v598_v5 = vpop.f32.mrb[14].mxu0 }
  0xfc   :  { %v323_v6 = vmul.f32 %v598_v5, %v920_v21  ;;  %v225_v7 = vpop.f32.mrb[15].mxu0 }
  0xfd   :  { %724 = vmatpush3.bf16.xpose.msk.msra.mxu0 %vm926_vm1, %v722_v53  ;;  %v322_v8 = vmul.f32 %v225_v7, %v911_v20 }
  0xfe   :  { %725 = vmatprep.subr.bf16.mxu0 %v770_v23 }
  0xff   :  { %v738_v9 = vpack.c.bf16 %v323_v6, %v322_v8 }
 0x105   :  { %728 = vmatpush3.bf16.xpose.msk.msra.mxu0 %vm926_vm1, %v726_v58 }
 0x106   :  { %729 = vmatprep.subr.bf16.mxu0 %v770_v23 }
 0x10d   :  { %732 = vmatpush3.bf16.xpose.msk.msra.mxu0 %vm926_vm1, %v730_v63 }
 0x10e   :  { %733 = vmatprep.subr.bf16.mxu0 %v770_v23 }
 0x115   :  { %736 = vmatpush3.bf16.xpose.msk.msra.mxu0 %vm926_vm1, %v734_v4 }
 0x116   :  { %737 = vmatprep.subr.bf16.mxu0 %v770_v23 }
 0x11d   :  { %740 = vmatpush3.bf16.xpose.msk.msra.mxu0 %vm926_vm1, %v738_v9 }
 0x11f   :  { %v304_v11 = vpop.f32.mrb[0].mxu1 }
 0x120   :  { %445 = vst [vmem:[#allocation3] sm:$0x1] %v304_v11  ;;  %v633_v12 = vpop.f32.mrb[1].mxu1 }
 0x124   :  { %667 = vmatmul.mubr.msk.f32.vlgmr.msra.gmra.mrb[16].mxu0 %vm40_vm0, %v773_v10 }
 0x1f7   :  { %v441_v14 = vpop.f32.mrb[16].mxu0 }
 0x1f8   :  { %v447_v15 = vadd.f32 %v446_v13, %v441_v14  ;;  %v668_v16 = vpop.f32.mrb[17].mxu0 }
 0x1fa   :  { %448 = vst [vmem:[#allocation3 + $0x1] sm:$0x1] %v447_v15 }
 0x1fb   :  { %757 = shalt.err (!%p754_p4)
}
 0x1fc   :  { %s758_s8 = scalar_lea.hbm %s1034_s4, 32 }
 0x1fd   :  { %p759_p5 = scmp.ne.s32.totalorder %s1034_s4, %s758_s8  ;;  %p762_p6 = scmp.lt.u32.totalorder %s758_s8, %s1034_s4 }
 0x1ff   :  { %p764_p7 = pnand %p762_p6, %p759_p5 }
 0x201   :  { %767 = shalt.err (!%p764_p7)
}
 0x202   :  { %458 = dma.vmem_to_hbm [thread:$0]  %s456_s30, 32, %s1034_s4, [#allocation4]  }
 0x203   :  { %768 = dma.done.wait [#allocation4], 32  }
 0x204   :  { %769 = vsyncadd [#allocation4], 4294967264 }
 0x205   :  { %462 = vsyncpa [#allocation4], 1 }

</bundles_post_ra>
